<compile_context>
chip_gen: v5e
topology: v5e:2x2
jax: 0.10.0
libtpu: 0.0.40
codegen_flags: <defaults>
</compile_context>

<pallas_src>
import functools

import jax
import jax.numpy as jnp
from jax.experimental import pallas as pl
from jax.experimental.pallas import tpu as pltpu

ALPHA = 0.25
GAMMA = 2.0          # gamma == 2 is compiled as (1 - pt) * (1 - pt) below
LANES = 128
SUBLANES = 8


def _focal_loss_kernel(x_ref, t_ref, o_ref, *, tile_rows, tiles_per_core,
                       n_elems, any_masked):
    c = pl.program_id(0)
    i = pl.program_id(1)

    @pl.when(i == 0)
    def _():
        o_ref[...] = jnp.zeros_like(o_ref)

    x = x_ref[...].astype(jnp.float32)
    t = t_ref[...].astype(jnp.float32)

    # Numerically stable BCE-with-logits (same formulation as torch):
    #   bce = max(x, 0) - x*t + log(1 + exp(-|x|))
    bce = jnp.maximum(x, 0.0) - x * t + jnp.log1p(jnp.exp(-jnp.abs(x)))
    pt = jnp.exp(-bce)
    one_minus_pt = 1.0 - pt
    focal = ALPHA * (one_minus_pt * one_minus_pt) * bce   # gamma == 2.0

    def accumulate(f):
        # Tile -> one (8, 128) vreg of partial sums (sublane adds, VALU-only).
        part = jnp.sum(f.reshape(tile_rows // SUBLANES, SUBLANES, LANES),
                       axis=0)
        o_ref[...] += part

    if not any_masked:
        accumulate(focal)
    else:
        g = c * tiles_per_core + i                 # global tile id
        n_full_rows = n_elems // LANES             # rows with all 128 lanes valid
        n_valid_rows = -(-n_elems // LANES)        # rows with >= 1 valid lane
        tail_lanes = n_elems % LANES
        # Scalar "is this tile fully valid" test: no per-element work and no
        # elem = row*128+lane multiply (int32-safe for huge tensors).
        is_full = (g + 1) * tile_rows <= n_full_rows

        @pl.when(is_full)
        def _():
            accumulate(focal)

        @pl.when(jnp.logical_not(is_full))
        def _():
            # Boundary / overhang tile only: mask invalid rows (and, on the
            # last row, invalid lanes) with a select so garbage in padded or
            # out-of-bounds regions cannot poison the sum.
            row0 = g * tile_rows
            rid = row0 + jax.lax.broadcasted_iota(jnp.int32,
                                                  (tile_rows, LANES), 0)
            if tail_lanes == 0:
                valid = rid < n_valid_rows
            else:
                lid = jax.lax.broadcasted_iota(jnp.int32,
                                               (tile_rows, LANES), 1)
                valid = (rid < n_valid_rows - 1) | (
                    (rid == n_valid_rows - 1) & (lid < tail_lanes))
            accumulate(jnp.where(valid, focal, 0.0))


def _sublane_granularity(dtype):
    # Packed min-tile second-to-last dim: 8 (4-byte), 16 (2-byte), 32 (1-byte).
    itemsize = jnp.dtype(dtype).itemsize
    return max(SUBLANES, SUBLANES * (4 // itemsize))


def focal_loss(inputs, targets, *, tile_rows=4096):
    """Mean focal loss (alpha=0.25, gamma=2.0) over all elements, any shape."""
    assert inputs.shape == targets.shape
    n_elems = inputs.size
    assert n_elems > 0

    gran = max(_sublane_granularity(inputs.dtype),
               _sublane_granularity(targets.dtype))
    tile_rows = max(gran, (tile_rows // gran) * gran)

    rows_needed = -(-n_elems // LANES)

    if n_elems % LANES == 0 and rows_needed >= gran:
        # Aligned path (the common case): ravel + reshape is metadata-only,
        # zero extra HBM traffic, no pad copy.
        rows = rows_needed
        pad_to = n_elems
    else:
        # Element count not divisible by 128 (or tiny input): pad the flat
        # copy up to whole `gran` rows.  NOTE: jnp.pad materialises a copy of
        # the whole tensor — accepted and documented; it only triggers for
        # non-128-divisible element counts (or < gran*128 elements).
        rows = -(-rows_needed // gran) * gran
        pad_to = rows * LANES

    def to_slab(a):
        flat = jnp.ravel(a)
        if pad_to != n_elems:
            flat = jnp.pad(flat, (0, pad_to - n_elems))
        return flat.reshape(rows, LANES)

    x2 = to_slab(inputs)
    t2 = to_slab(targets)

    # Row tile: large enough to amortise the ~0.35 us per-grid-step overhead,
    # small enough that 2 inputs x 2 pipeline buffers + elementwise f32
    # temporaries stay inside the 32 MiB scoped-VMEM limit on every chip
    # (v7x's 64 MiB physical VMEM is nowhere near a constraint at this size).
    tile = min(tile_rows, (rows // gran) * gran)
    tiles_total = -(-rows // tile)

    # Two partial-sum streams whenever there is more than one tile so both
    # v7x TensorCores always get work (v5e/v6e simply iterate this axis).  An
    # odd tile count yields one overhang step whose block index is clamped to
    # the last block and whose contribution is fully masked in-kernel.
    nc = 2 if tiles_total >= 2 else 1
    tiles_per_core = -(-tiles_total // nc)
    covered_elems = nc * tiles_per_core * tile * LANES
    any_masked = covered_elems != n_elems

    kernel = functools.partial(
        _focal_loss_kernel, tile_rows=tile, tiles_per_core=tiles_per_core,
        n_elems=n_elems, any_masked=any_masked)

    last_block = tiles_total - 1
    if nc * tiles_per_core == tiles_total:
        in_map = lambda c, i: (c * tiles_per_core + i, 0)
    else:
        in_map = lambda c, i: (jnp.minimum(c * tiles_per_core + i, last_block),
                               0)

    partials = pl.pallas_call(
        kernel,
        out_shape=jax.ShapeDtypeStruct((nc * SUBLANES, LANES), jnp.float32),
        grid_spec=pltpu.PrefetchScalarGridSpec(
            num_scalar_prefetch=0,
            grid=(nc, tiles_per_core),
            in_specs=[
                pl.BlockSpec((tile, LANES), in_map),
                pl.BlockSpec((tile, LANES), in_map),
            ],
            out_specs=pl.BlockSpec((SUBLANES, LANES), lambda c, i: (c, 0)),
        ),
        compiler_params=pltpu.CompilerParams(
            dimension_semantics=("parallel", "arbitrary"),
            vmem_limit_bytes=32 * 1024 * 1024,
        ),
    )(x2, t2)

    # Tiny epilogue in XLA: tree-reduce <= 2048 partials and divide by N
    # (more accurate than a serial scalar accumulator in the kernel).
    return jnp.sum(partials) / jnp.float32(n_elems)


def focal_loss_ref(inputs, targets):
    x = inputs.astype(jnp.float32)
    t = targets.astype(jnp.float32)
    bce = jnp.maximum(x, 0.0) - x * t + jnp.log1p(jnp.exp(-jnp.abs(x)))
    pt = jnp.exp(-bce)
    return jnp.mean(ALPHA * (1.0 - pt) ** GAMMA * bce)


if __name__ == "__main__":
    key = jax.random.PRNGKey(0)
    k1, k2, k3, k4, k5, k6 = jax.random.split(key, 6)

    # NCHW logits + binary targets: batch=2, channels=4, 16x16 spatial.
    x = jax.random.normal(k1, (2, 4, 16, 16), dtype=jnp.float32) * 2.0
    t = (jax.random.uniform(k2, (2, 4, 16, 16)) > 0.5).astype(jnp.float32)
    ref = focal_loss_ref(x, t)

    # Default (single big tile) path.
    out = jax.block_until_ready(focal_loss(x, t))
    assert jnp.allclose(out, ref, rtol=1e-5, atol=1e-6), (out, ref)

    # Multi-tile path, even tile count -> two unmasked partial-sum streams.
    out2 = jax.block_until_ready(focal_loss(x, t, tile_rows=8))
    assert jnp.allclose(out2, ref, rtol=1e-5, atol=1e-6), (out2, ref)

    # Odd tile count -> clamped + fully-masked overhang tile on stream 1.
    x3 = jax.random.normal(k3, (3, 4, 16, 16), dtype=jnp.float32) * 2.0
    t3 = (jax.random.uniform(k4, (3, 4, 16, 16)) > 0.5).astype(jnp.float32)
    ref3 = focal_loss_ref(x3, t3)
    out3 = jax.block_until_ready(focal_loss(x3, t3, tile_rows=8))
    assert jnp.allclose(out3, ref3, rtol=1e-5, atol=1e-6), (out3, ref3)

    # Ragged element count (not divisible by 128) -> padded path + lane mask.
    xr = jax.random.normal(k5, (3, 5, 7, 11), dtype=jnp.float32) * 2.0
    tr = (jax.random.uniform(k6, (3, 5, 7, 11)) > 0.5).astype(jnp.float32)
    refr = focal_loss_ref(xr, tr)
    outr = jax.block_until_ready(focal_loss(xr, tr, tile_rows=8))
    assert jnp.allclose(outr, refr, rtol=1e-5, atol=1e-6), (outr, refr)

    # bf16 inputs: dtype-aware (16,128)-granular tiling; kernel upcasts on load.
    xb = x.astype(jnp.bfloat16)
    tb = t.astype(jnp.bfloat16)
    refb = focal_loss_ref(xb, tb)
    outb = jax.block_until_ready(focal_loss(xb, tb))
    assert jnp.allclose(outb, refb, rtol=1e-5, atol=1e-6), (outb, refb)

    print("KERNEL_OK")
</pallas_src>

<mosaic_0001>
module attributes {stable_mosaic.version = 11 : i64} {
  func.func @_focal_loss_kernel(%arg0: i32, %arg1: i32, %arg2: memref<16x128xf32, #tpu.memory_space<vmem>>, %arg3: memref<16x128xf32, #tpu.memory_space<vmem>>, %arg4: memref<8x128xf32, #tpu.memory_space<vmem>>) attributes {dimension_semantics = [#tpu.dimension_semantics<parallel>, #tpu.dimension_semantics<arbitrary>], iteration_bounds = array<i64: 1, 1>, scalar_prefetch = 0 : i64, scratch_operands = 0 : i64, tpu.core_type = #tpu.core_type<tc>, window_params = [{transform_indices = @transform_0, window_bounds = array<i64: 16, 128>}, {transform_indices = @transform_1, window_bounds = array<i64: 16, 128>}, {transform_indices = @transform_2, window_bounds = array<i64: 8, 128>}]} {
    %c0_i32 = arith.constant 0 : i32
    %0 = arith.cmpi eq, %arg1, %c0_i32 : i32
    %1 = arith.extui %0 : i1 to i32
    %c0_i32_0 = arith.constant 0 : i32
    %2 = arith.cmpi ne, %1, %c0_i32_0 : i32
    scf.if %2 {
      %cst_13 = arith.constant 0.000000e+00 : f32
      %29 = vector.broadcast %cst_13 : f32 to vector<8x128xf32>
      %c0_14 = arith.constant 0 : index
      %c0_15 = arith.constant 0 : index
      %30 = vector.load %arg4[%c0_14, %c0_15] : memref<8x128xf32, #tpu.memory_space<vmem>>, vector<8x128xf32>
      tpu.vector_store %arg4[%c0_14, %c0_15], %29 {strides = array<i32>} : memref<8x128xf32, #tpu.memory_space<vmem>>, vector<8x128xf32>,
    } else {
    }
    %c0 = arith.constant 0 : index
    %c0_1 = arith.constant 0 : index
    %3 = vector.load %arg2[%c0, %c0_1] : memref<16x128xf32, #tpu.memory_space<vmem>>, vector<16x128xf32>
    %c0_2 = arith.constant 0 : index
    %c0_3 = arith.constant 0 : index
    %4 = vector.load %arg3[%c0_2, %c0_3] : memref<16x128xf32, #tpu.memory_space<vmem>>, vector<16x128xf32>
    %cst = arith.constant 0.000000e+00 : f32
    %5 = vector.broadcast %cst : f32 to vector<16x128xf32>
    %6 = arith.maximumf %3, %5 : vector<16x128xf32>
    %7 = arith.mulf %3, %4 : vector<16x128xf32>
    %8 = arith.subf %6, %7 : vector<16x128xf32>
    %9 = math.absf %3 : vector<16x128xf32>
    %cst_4 = arith.constant 0.000000e+00 : f32
    %10 = vector.broadcast %cst_4 : f32 to vector<16x128xf32>
    %11 = arith.subf %10, %9 : vector<16x128xf32>
    %12 = math.exp %11 : vector<16x128xf32>
    %13 = math.log1p %12 : vector<16x128xf32>
    %14 = arith.addf %8, %13 : vector<16x128xf32>
    %cst_5 = arith.constant 0.000000e+00 : f32
    %15 = vector.broadcast %cst_5 : f32 to vector<16x128xf32>
    %16 = arith.subf %15, %14 : vector<16x128xf32>
    %17 = math.exp %16 : vector<16x128xf32>
    %cst_6 = arith.constant 1.000000e+00 : f32
    %18 = vector.broadcast %cst_6 : f32 to vector<16x128xf32>
    %19 = arith.subf %18, %17 : vector<16x128xf32>
    %20 = arith.mulf %19, %19 : vector<16x128xf32>
    %cst_7 = arith.constant 2.500000e-01 : f32
    %21 = vector.broadcast %cst_7 : f32 to vector<16x128xf32>
    %22 = arith.mulf %21, %20 : vector<16x128xf32>
    %23 = arith.mulf %22, %14 : vector<16x128xf32>
    %24 = vector.shape_cast %23 : vector<16x128xf32> to vector<2x8x128xf32>
    %cst_8 = arith.constant dense<0.000000e+00> : vector<8x128xf32>
    %25 = vector.multi_reduction <add>, %24, %cst_8 [0] : vector<2x8x128xf32> to vector<8x128xf32>
    %c0_9 = arith.constant 0 : index
    %c0_10 = arith.constant 0 : index
    %26 = vector.load %arg4[%c0_9, %c0_10] : memref<8x128xf32, #tpu.memory_space<vmem>>, vector<8x128xf32>
    %27 = arith.addf %26, %25 : vector<8x128xf32>
    %c0_11 = arith.constant 0 : index
    %c0_12 = arith.constant 0 : index
    %28 = vector.load %arg4[%c0_11, %c0_12] : memref<8x128xf32, #tpu.memory_space<vmem>>, vector<8x128xf32>
    tpu.vector_store %arg4[%c0_11, %c0_12], %27 {strides = array<i32>} : memref<8x128xf32, #tpu.memory_space<vmem>>, vector<8x128xf32>,
    return
  }
  func.func @transform_0(%arg0: i32, %arg1: i32) -> (i32, i32) {
    %c1_i32 = arith.constant 1 : i32
    %0 = arith.muli %arg0, %c1_i32 : i32
    %1 = arith.addi %0, %arg1 : i32
    %c0_i32 = arith.constant 0 : i32
    %c0_i32_0 = arith.constant 0 : i32
    return %1, %c0_i32 : i32, i32
  }
  func.func @transform_1(%arg0: i32, %arg1: i32) -> (i32, i32) {
    %c1_i32 = arith.constant 1 : i32
    %0 = arith.muli %arg0, %c1_i32 : i32
    %1 = arith.addi %0, %arg1 : i32
    %c0_i32 = arith.constant 0 : i32
    %c0_i32_0 = arith.constant 0 : i32
    return %1, %c0_i32 : i32, i32
  }
  func.func @transform_2(%arg0: i32, %arg1: i32) -> (i32, i32) {
    %c0_i32 = arith.constant 0 : i32
    %c0_i32_0 = arith.constant 0 : i32
    return %arg0, %c0_i32 : i32, i32
  }
}

</mosaic_0001>

<bundles_post_ra>
// kernel: tpu_custom_call.1
= control target key start
LH: loop header
LB: loop body
LE: loop exit
PB: predicated region body
PF: predicated region fallthrough
CT: control target
= control target key end

     0   :  { %7 = vsyncpa [#allocation3], 0  ;;  %s260_s0 = inlined_call_operand.hbm [shape: f32[16,128], index: 0, kind: input, shape index: {}]   ;;  %s261_s1 = inlined_call_operand.hbm [shape: f32[16,128], index: 1, kind: input, shape index: {}]   ;;  %s262_s2 = inlined_call_operand.hbm [shape: f32[8,128], index: 2, kind: output, shape index: {}]  }
   0x1   :  { %8 = vsyncpa [#allocation6], 0 }
   0x2   :  { %9 = vsyncpa [#allocation4], 0  ;;  %s18_s11 = sshll.u32 %s260_s0, 4  ;;  %s231_s12 = smov [#allocation2]   ;;  %s19_s11 = int_to_ptr.hbm [resolvable:$true] %s18_s11 }
   0x3   :  { %s20_s13 = sshll.u32 %s231_s12, 4  ;;  %s35_s16 = sshll.u32 %s261_s1, 4  ;;  %s21_s13 = int_to_ptr.vmem [resolvable:$true] %s20_s13  ;;  %s36_s16 = int_to_ptr.hbm [resolvable:$true] %s35_s16 }
   0x4   :  { %s232_s17 = smov 128   ;;  %s233_s18 = smov 8  }
   0x5   :  { %26 = dma.hbm_to_vmem [thread:$0]  %s19_s11, 256, %s21_s13, [#allocation3], %s232_s17, %s232_s17, %s233_s18  }
   0x6   :  { %s234_s19 = smov [#allocation5]  }
   0x7   :  { %s37_s20 = sshll.u32 %s234_s19, 4  ;;  %s38_s20 = int_to_ptr.vmem [resolvable:$true] %s37_s20 }
   0x8   :  { %43 = dma.hbm_to_vmem [thread:$0]  %s36_s16, 256, %s38_s20, [#allocation6], %s232_s17, %s232_s17, %s233_s18  }
   0x9   :  { %225 = dma.done.wait [#allocation3], 256  }
   0xa   :  { %226 = vsyncadd [#allocation3], 4294967040 }
   0xb   :  { %227 = dma.done.wait [#allocation6], 256  }
   0xc   :  { %228 = vsyncadd [#allocation6], 4294967040  ;;  %v61_v0 = vld [vmem:[#allocation2] sm:$0xff]  ;;  %v62_v1 = vld [vmem:[#allocation2 + $0x8] sm:$0xff]  ;;  %s235_s0 = smov [#allocation7]   ;;  %s124_s23 = sshll.u32 %s262_s2, 4  ;;  %s125_s23 = int_to_ptr.hbm [resolvable:$true] %s124_s23 }
   0xd   :  { %v71_v2 = vand.u32 2147483647, %v61_v0  ;;  %v72_v3 = vand.u32 2147483647, %v62_v1  ;;  %v63_v12 = vld [vmem:[#allocation5] sm:$0xff]  ;;  %v64_v15 = vld [vmem:[#allocation5 + $0x8] sm:$0xff] }
   0xe   :  { %v65_v17 = vmax.f32 %v61_v0, 0.0  ;;  %v67_v18 = vmul.f32 %v63_v12, %v61_v0  ;;  %v66_v21 = vmax.f32 %v62_v1, 0.0  ;;  %v68_v22 = vmul.f32 %v64_v15, %v62_v1  ;;  %s122_s1 = sshll.u32 %s235_s0, 4  ;;  %s123_s1 = int_to_ptr.vmem [resolvable:$true] %s122_s1 }
   0xf   :  { %v73_v4 = vsub.f32 0.0, %v71_v2  ;;  %v74_v5 = vsub.f32 0.0, %v72_v3 }
  0x10   :  { %v69_v26 = vsub.f32 %v65_v17, %v67_v18  ;;  %v70_v29 = vsub.f32 %v66_v21, %v68_v22 }
  0x11   :  { %v75_v6 = vmul.f32 1.442695, %v73_v4  ;;  %v77_v7 = vmul.f32 1.442695, %v74_v5 }
  0x13   :  { %141 = vpow2.f32 %v75_v6 }
  0x14   :  { %143 = vpow2.f32 %v77_v7 }
  0x19   :  { %v142_v8 = vpop.eup %141 }
  0x1a   :  { %v144_v9 = vpop.eup %143  ;;  %v79_v10 = vadd.f32 1.0, %v142_v8  ;;  %v82_v11 = vmul.f32 -0.5, %v142_v8  ;;  %v85_v19 = vand.u32 2147483647, %v142_v8 }
  0x1b   :  { %v88_v13 = vadd.f32 1.0, %v144_v9  ;;  %v91_v14 = vmul.f32 -0.5, %v144_v9  ;;  %v94_v23 = vand.u32 2147483647, %v144_v9 }
  0x1c   :  { %145 = vlog2.f32 %v79_v10  ;;  %v83_v16 = vadd.f32 1.0, %v82_v11  ;;  %vm86_vm0 = vcmp.lt.f32.partialorder %v85_v19, 0.0004427343 }
  0x1d   :  { %147 = vlog2.f32 %v88_v13  ;;  %v92_v20 = vadd.f32 1.0, %v91_v14  ;;  %vm95_vm1 = vcmp.lt.f32.partialorder %v94_v23, 0.0004427343 }
  0x1e   :  { %v84_v24 = vmul.f32 %v142_v8, %v83_v16 }
  0x1f   :  { %v93_v27 = vmul.f32 %v144_v9, %v92_v20 }
  0x22   :  { %v146_v25 = vpop.eup %145 }
  0x23   :  { %v148_v28 = vpop.eup %147  ;;  %v81_v30 = vmul.f32 0.6931472, %v146_v25 }
  0x24   :  { %v90_v31 = vmul.f32 0.6931472, %v148_v28 }
  0x25   :  { %v87_v32 = vsel %vm86_vm0, %v84_v24, %v81_v30 }
  0x26   :  { %v96_v33 = vsel %vm95_vm1, %v93_v27, %v90_v31  ;;  %v97_v34 = vadd.f32 %v87_v32, %v69_v26 }
  0x27   :  { %v98_v35 = vadd.f32 %v96_v33, %v70_v29 }
  0x28   :  { %v99_v36 = vsub.f32 0.0, %v97_v34 }
  0x29   :  { %v100_v37 = vsub.f32 0.0, %v98_v35 }
  0x2a   :  { %v101_v38 = vmul.f32 1.442695, %v99_v36 }
  0x2b   :  { %v103_v39 = vmul.f32 1.442695, %v100_v37 }
  0x2c   :  { %149 = vpow2.f32 %v101_v38 }
  0x2d   :  { %151 = vpow2.f32 %v103_v39 }
  0x32   :  { %v150_v40 = vpop.eup %149 }
  0x33   :  { %v152_v41 = vpop.eup %151  ;;  %v105_v42 = vsub.f32 1.0, %v150_v40 }
  0x34   :  { %v106_v43 = vsub.f32 1.0, %v152_v41 }
  0x35   :  { %v107_v44 = vmul.f32 %v105_v42, %v105_v42 }
  0x36   :  { %v108_v45 = vmul.f32 %v106_v43, %v106_v43 }
  0x37   :  { %v109_v46 = vmul.f32 0.25, %v107_v44 }
  0x38   :  { %v110_v47 = vmul.f32 0.25, %v108_v45 }
  0x39   :  { %v111_v48 = vmul.f32 %v109_v46, %v97_v34 }
  0x3a   :  { %v112_v49 = vmul.f32 %v110_v47, %v98_v35 }
  0x3c   :  { %v113_v50 = vadd.f32 %v112_v49, %v111_v48 }
  0x3e   :  { %116 = vst [vmem:[#allocation7] sm:$0xff] %v113_v50 }
  0x3f   :  { %127 = dma.vmem_to_hbm [thread:$0]  %s123_s1, 128, %s125_s23, [#allocation4]  }
  0x40   :  { %229 = dma.done.wait [#allocation4], 128  }
  0x41   :  { %230 = vsyncadd [#allocation4], 4294967168 }
  0x42   :  { %132 = vsyncpa [#allocation3], 1 }
  0x43   :  { %133 = vsyncpa [#allocation6], 1 }
  0x44   :  { %134 = vsyncpa [#allocation4], 1 }

</bundles_post_ra>
